<compile_context>
chip_gen: v6e
topology: v6e:2x2x1
jax: 0.10.0
libtpu: 0.0.40
codegen_flags: <defaults>
</compile_context>

<pallas_src>
import functools

import numpy as np
import jax
import jax.numpy as jnp
from jax.experimental import pallas as pl
from jax.experimental.pallas import tpu as pltpu


# ----------------------------------------------------------------------------
# Filter / matrix construction (host side, mirrors get_filter in networks.py)
# ----------------------------------------------------------------------------
def get_filter_1d(filt_size=3):
    if filt_size == 1:
        a = np.array([1.0])
    elif filt_size == 2:
        a = np.array([1.0, 1.0])
    elif filt_size == 3:
        a = np.array([1.0, 2.0, 1.0])
    elif filt_size == 4:
        a = np.array([1.0, 3.0, 3.0, 1.0])
    elif filt_size == 5:
        a = np.array([1.0, 4.0, 6.0, 4.0, 1.0])
    elif filt_size == 6:
        a = np.array([1.0, 5.0, 10.0, 10.0, 5.0, 1.0])
    elif filt_size == 7:
        a = np.array([1.0, 6.0, 15.0, 20.0, 15.0, 6.0, 1.0])
    else:
        raise ValueError(f"unsupported filt_size {filt_size}")
    # outer(a, a) / sum(outer(a, a)) == outer(a/sum(a), a/sum(a))  -> separable
    return (a / a.sum()).astype(np.float64)


def _blur_matrix(n_in, taps, stride, pad_l, pad_r, pad_mode):
    """1-D (pad + blur + stride) folded into a dense (n_out, n_in) matrix."""
    k = len(taps)
    n_out = (n_in + pad_l + pad_r - k) // stride + 1
    mat = np.zeros((n_out, n_in), np.float64)
    for i in range(n_out):
        for d in range(k):
            src = stride * i + d - pad_l
            if src < 0:
                if pad_mode == "reflect":       # ReflectionPad: -k -> k
                    src = -src
                elif pad_mode == "replicate":
                    src = 0
                else:                           # zero pad
                    continue
            elif src >= n_in:
                if pad_mode == "reflect":       # n-1+k -> n-1-k
                    src = 2 * (n_in - 1) - src
                elif pad_mode == "replicate":
                    src = n_in - 1
                else:
                    continue
            mat[i, src] += taps[d]
    return mat


def _assert_bf16_exact(mat, name):
    """Every matrix entry must survive a bf16 round-trip exactly (accuracy
    argument for the hi/lo-split fast path relies on it)."""
    rt = mat.astype(np.float32).astype(jnp.bfloat16).astype(np.float64)
    assert np.array_equal(rt, mat), (
        f"{name} entries are not exactly representable in bf16; the exact "
        f"hi/lo-split accuracy argument does not hold for this filter/pad "
        f"configuration.")


def _pick_channel_tile(N, C, H, W, Ho, Wo, itemsize, split_input,
                       vmem_budget=24 * 1024 * 1024, max_tile=64):
    """Largest divisor of C whose full per-step VMEM footprint fits the budget.

    Budget counts: double-buffered in/out blocks + the intermediate scratch +
    a conservative estimate of in-kernel temporaries (f32 cast, hi/lo splits,
    f32 matmul results).  24 MiB keeps us well inside v7x's 64 MiB VMEM.
    """
    isz = max(itemsize, 2)
    per_ch = 2 * (H * W + Ho * Wo) * isz            # in + out, double-buffered
    per_ch += H * Wo * (4 if split_input else 2)    # intermediate scratch
    if split_input:                                 # in-kernel temporaries
        per_ch += H * W * 8 + H * Wo * 4
    else:
        per_ch += H * Wo * 4
    cap = max(1, vmem_budget // max(per_ch, 1))
    cap = min(cap, max_tile, C)
    if N == 1 and C > 1:
        # keep >= 2 grid points so both v7x TensorCores get work
        cap = min(cap, max(1, C // 2))
    tc = 1
    for d in range(1, cap + 1):
        if C % d == 0:
            tc = d
    return tc


# ----------------------------------------------------------------------------
# Pallas kernel: per grid step processes (tc, H, W) channels of one image.
#   out[t] = A_v @ x[t] @ A_h^T      (padding/blur/stride folded into A_*)
# ----------------------------------------------------------------------------
def _downsample_kernel(av_ref, aht_ref, x_ref, o_ref, y_ref, *,
                       channel_tile, height, split_input):
    tc, H = channel_tile, height
    av = av_ref[...]      # (Ho, H)  bf16 (exact dyadic rationals)
    aht = aht_ref[...]    # (W,  Wo) bf16

    # ---- pass 1 (horizontal): ONE fused MXU matmul over the whole tile ----
    x = x_ref[...]                                   # (tc, H, W)
    x2 = x.reshape(tc * H, x.shape[-1])              # (tc*H, W)
    if split_input:
        xf = x2.astype(jnp.float32)
        x_hi = xf.astype(jnp.bfloat16)
        x_lo = (xf - x_hi.astype(jnp.float32)).astype(jnp.bfloat16)
        y = (jnp.dot(x_hi, aht, preferred_element_type=jnp.float32)
             + jnp.dot(x_lo, aht, preferred_element_type=jnp.float32))
    else:
        y = jnp.dot(x2, aht, preferred_element_type=jnp.float32)
    y_ref[...] = y.astype(y_ref.dtype)               # (tc*H, Wo) VMEM scratch

    # ---- pass 2 (vertical): per-channel matmul from the halved scratch ----
    @pl.loop(0, tc)
    def _(t):
        start = t * H
        if H % 8 == 0:
            start = pl.multiple_of(start, 8)
        yc = y_ref[pl.ds(start, H), :]               # (H, Wo)
        if split_input:
            y_hi = yc.astype(jnp.bfloat16)
            y_lo = (yc - y_hi.astype(jnp.float32)).astype(jnp.bfloat16)
            z = (jnp.dot(av, y_hi, preferred_element_type=jnp.float32)
                 + jnp.dot(av, y_lo, preferred_element_type=jnp.float32))
        else:
            z = jnp.dot(av, yc, preferred_element_type=jnp.float32)
        o_ref[t] = z.astype(o_ref.dtype)             # (Ho, Wo) store


# ----------------------------------------------------------------------------
# Wrapper reproducing Downsample.forward (NCHW in, NCHW out, no layout glue)
# ----------------------------------------------------------------------------
def downsample(x_nchw, *, channels=None, pad_type="reflect", filt_size=3,
               stride=2, pad_off=0, channel_tile=None):
    N, C, H, W = x_nchw.shape
    if channels is not None:
        assert C == channels, "channel mismatch with module configuration"

    pad_l = int(1.0 * (filt_size - 1) / 2) + pad_off
    pad_r = int(np.ceil(1.0 * (filt_size - 1) / 2)) + pad_off

    mode = {"refl": "reflect", "reflect": "reflect",
            "repl": "replicate", "replicate": "replicate",
            "zero": "zero"}[pad_type]

    taps = get_filter_1d(filt_size)
    # Note: filt_size == 1 / pad_off == 0 (pure strided slicing in PyTorch) is
    # reproduced exactly: the matrices reduce to row/column selection matrices.
    A_v = _blur_matrix(H, taps, stride, pad_l, pad_r, mode)   # (Ho, H)
    A_h = _blur_matrix(W, taps, stride, pad_l, pad_r, mode)   # (Wo, W)
    Ho, Wo = A_v.shape[0], A_h.shape[0]

    _assert_bf16_exact(A_v, "A_v")
    _assert_bf16_exact(A_h, "A_h")
    a_v = jnp.asarray(A_v, dtype=jnp.bfloat16)      # exact in bf16
    a_ht = jnp.asarray(A_h.T, dtype=jnp.bfloat16)   # (W, Wo)

    dtype = jnp.dtype(x_nchw.dtype)
    itemsize = dtype.itemsize
    split_input = itemsize >= 4          # f32 -> exact bf16 hi/lo split
    inter_dtype = jnp.float32 if split_input else jnp.bfloat16

    tc = channel_tile or _pick_channel_tile(N, C, H, W, Ho, Wo, itemsize,
                                            split_input)
    assert C % tc == 0

    kernel = functools.partial(_downsample_kernel, channel_tile=tc, height=H,
                               split_input=split_input)

    passes = 2 if split_input else 1
    flops = 2 * N * C * (H * W * Wo + Ho * H * Wo) * passes
    bytes_accessed = N * C * (H * W + Ho * Wo) * itemsize + (Ho * H + W * Wo) * 2

    out = pl.pallas_call(
        kernel,
        out_shape=jax.ShapeDtypeStruct((N, C, Ho, Wo), x_nchw.dtype),
        grid_spec=pltpu.PrefetchScalarGridSpec(
            num_scalar_prefetch=0,
            grid=(N, C // tc),
            in_specs=[
                # small constant blur matrices: same block every step (stays
                # resident in VMEM across the grid)
                pl.BlockSpec((Ho, H), lambda n, c: (0, 0)),
                pl.BlockSpec((W, Wo), lambda n, c: (0, 0)),
                # channel-tiled NCHW input block, batch dim squeezed
                pl.BlockSpec((None, tc, H, W), lambda n, c: (n, c, 0, 0)),
            ],
            out_specs=pl.BlockSpec((None, tc, Ho, Wo), lambda n, c: (n, c, 0, 0)),
            scratch_shapes=[pltpu.VMEM((tc * H, Wo), inter_dtype)],
        ),
        compiler_params=pltpu.CompilerParams(
            dimension_semantics=("parallel", "parallel"),
            vmem_limit_bytes=48 * 1024 * 1024),
        cost_estimate=pl.CostEstimate(flops=flops, transcendentals=0,
                                      bytes_accessed=bytes_accessed),
    )(a_v, a_ht, x_nchw)
    return out


# ----------------------------------------------------------------------------
# Pure-JAX reference (XLA depthwise conv) for the correctness check
# ----------------------------------------------------------------------------
def _reference(x_nchw, *, channels, filt_size=3, stride=2, pad_off=0):
    pad_l = int(1.0 * (filt_size - 1) / 2) + pad_off
    pad_r = int(np.ceil(1.0 * (filt_size - 1) / 2)) + pad_off
    a = get_filter_1d(filt_size)
    filt = jnp.asarray(np.outer(a, a), dtype=jnp.float32)
    xp = jnp.pad(x_nchw, ((0, 0), (0, 0), (pad_l, pad_r), (pad_l, pad_r)),
                 mode="reflect")
    w = jnp.broadcast_to(filt[None, None], (channels, 1, filt_size, filt_size))
    return jax.lax.conv_general_dilated(
        xp, w, window_strides=(stride, stride), padding="VALID",
        feature_group_count=channels,
        dimension_numbers=("NCHW", "OIHW", "NCHW"),
        precision=jax.lax.Precision.HIGHEST)


if __name__ == "__main__":
    key = jax.random.PRNGKey(0)
    k_f32, k_bf16 = jax.random.split(key)

    # --- float32 path (exact bf16 hi/lo split) ---
    N, C, H, W = 2, 4, 16, 16
    x = jax.random.normal(k_f32, (N, C, H, W), dtype=jnp.float32)
    out = jax.block_until_ready(
        downsample(x, channels=C, pad_type="reflect", filt_size=3, stride=2))
    ref = jax.block_until_ready(_reference(x, channels=C, filt_size=3, stride=2))
    assert out.shape == (N, C, H // 2, W // 2), out.shape
    np.testing.assert_allclose(np.asarray(out), np.asarray(ref),
                               rtol=2e-4, atol=2e-4)

    # --- bf16 path (no split, no f32 upcast); N=1 exercises the >=2-grid-point
    # clamp for v7x's two TensorCores ---
    xb = jax.random.normal(k_bf16, (1, 8, 32, 32),
                           dtype=jnp.float32).astype(jnp.bfloat16)
    outb = jax.block_until_ready(downsample(xb, channels=8))
    refb = jax.block_until_ready(
        _reference(xb.astype(jnp.float32), channels=8, filt_size=3, stride=2))
    np.testing.assert_allclose(np.asarray(outb.astype(jnp.float32)),
                               np.asarray(refb), rtol=3e-2, atol=3e-2)

    print("KERNEL_OK")
</pallas_src>

<mosaic_0001>
module attributes {stable_mosaic.version = 11 : i64} {
  func.func @_downsample_kernel(%arg0: i32, %arg1: i32, %arg2: memref<8x16xbf16, #tpu.memory_space<vmem>>, %arg3: memref<16x8xbf16, #tpu.memory_space<vmem>>, %arg4: memref<1x4x16x16xf32, #tpu.memory_space<vmem>>, %arg5: memref<1x4x8x8xf32, #tpu.memory_space<vmem>>, %arg6: memref<64x8xf32, #tpu.memory_space<vmem>>) attributes {dimension_semantics = [#tpu.dimension_semantics<parallel>, #tpu.dimension_semantics<parallel>], iteration_bounds = array<i64: 2, 1>, scalar_prefetch = 0 : i64, scratch_operands = 1 : i64, tpu.core_type = #tpu.core_type<tc>, window_params = [{pipeline_mode = #tpu.pipeline_mode<synchronous>, transform_indices = @transform_0, window_bounds = array<i64: 8, 16>}, {pipeline_mode = #tpu.pipeline_mode<synchronous>, transform_indices = @transform_1, window_bounds = array<i64: 16, 8>}, {transform_indices = @transform_2, window_bounds = array<i64: 1, 4, 16, 16>}, {transform_indices = @transform_3, window_bounds = array<i64: 1, 4, 8, 8>}]} {
    %c0 = arith.constant 0 : index
    %c0_0 = arith.constant 0 : index
    %0 = vector.load %arg2[%c0, %c0_0] : memref<8x16xbf16, #tpu.memory_space<vmem>>, vector<8x16xbf16>
    %c0_1 = arith.constant 0 : index
    %c0_2 = arith.constant 0 : index
    %1 = vector.load %arg3[%c0_1, %c0_2] : memref<16x8xbf16, #tpu.memory_space<vmem>>, vector<16x8xbf16>
    %c0_3 = arith.constant 0 : index
    %c0_4 = arith.constant 0 : index
    %c0_5 = arith.constant 0 : index
    %c0_6 = arith.constant 0 : index
    %2 = vector.load %arg4[%c0_3, %c0_4, %c0_5, %c0_6] : memref<1x4x16x16xf32, #tpu.memory_space<vmem>>, vector<1x4x16x16xf32>
    %3 = vector.shape_cast %2 : vector<1x4x16x16xf32> to vector<4x16x16xf32>
    %4 = vector.shape_cast %3 : vector<4x16x16xf32> to vector<64x16xf32>
    %5 = arith.truncf %4 : vector<64x16xf32> to vector<64x16xbf16>
    %6 = arith.extf %5 : vector<64x16xbf16> to vector<64x16xf32>
    %7 = arith.subf %4, %6 : vector<64x16xf32>
    %8 = arith.truncf %7 : vector<64x16xf32> to vector<64x16xbf16>
    %cst = arith.constant dense<0.000000e+00> : vector<64x8xf32>
    %9 = tpu.matmul %5, %1, %cst {dimension_numbers = #tpu.dot_dimension_numbers<[1], [0], [0], [1], [0, 0, 1, 1], [], []>} : vector<64x16xbf16>, vector<16x8xbf16>, vector<64x8xf32> -> vector<64x8xf32>
    %cst_7 = arith.constant dense<0.000000e+00> : vector<64x8xf32>
    %10 = tpu.matmul %8, %1, %cst_7 {dimension_numbers = #tpu.dot_dimension_numbers<[1], [0], [0], [1], [0, 0, 1, 1], [], []>} : vector<64x16xbf16>, vector<16x8xbf16>, vector<64x8xf32> -> vector<64x8xf32>
    %11 = arith.addf %9, %10 : vector<64x8xf32>
    %c0_8 = arith.constant 0 : index
    %c0_9 = arith.constant 0 : index
    %12 = vector.load %arg6[%c0_8, %c0_9] : memref<64x8xf32, #tpu.memory_space<vmem>>, vector<64x8xf32>
    tpu.vector_store %arg6[%c0_8, %c0_9], %11 {strides = array<i32>} : memref<64x8xf32, #tpu.memory_space<vmem>>, vector<64x8xf32>,
    %c0_i32 = arith.constant 0 : i32
    %c4_i32 = arith.constant 4 : i32
    %13 = arith.addi %c0_i32, %c4_i32 : i32
    %c1_i32 = arith.constant 1 : i32
    scf.for %arg7 = %c0_i32 to %13 step %c1_i32  : i32 {
      %c1_i32_11 = arith.constant 1 : i32
      %14 = arith.muli %arg7, %c1_i32_11 : i32
      %c0_i32_12 = arith.constant 0 : i32
      %15 = arith.addi %c0_i32_12, %14 : i32
      %c16_i32 = arith.constant 16 : i32
      %16 = arith.muli %15, %c16_i32 : i32
      %17 = tpu.assume_multiple %16, 8 : i32
      %18 = arith.index_cast %17 : i32 to index
      %c0_13 = arith.constant 0 : index
      %19 = vector.load %arg6[%18, %c0_13] : memref<64x8xf32, #tpu.memory_space<vmem>>, vector<16x8xf32>
      %20 = arith.truncf %19 : vector<16x8xf32> to vector<16x8xbf16>
      %21 = arith.extf %20 : vector<16x8xbf16> to vector<16x8xf32>
      %22 = arith.subf %19, %21 : vector<16x8xf32>
      %23 = arith.truncf %22 : vector<16x8xf32> to vector<16x8xbf16>
      %cst_14 = arith.constant dense<0.000000e+00> : vector<8x8xf32>
      %24 = tpu.matmul %0, %20, %cst_14 {dimension_numbers = #tpu.dot_dimension_numbers<[1], [0], [0], [1], [0, 0, 1, 1], [], []>} : vector<8x16xbf16>, vector<16x8xbf16>, vector<8x8xf32> -> vector<8x8xf32>
      %cst_15 = arith.constant dense<0.000000e+00> : vector<8x8xf32>
      %25 = tpu.matmul %0, %23, %cst_15 {dimension_numbers = #tpu.dot_dimension_numbers<[1], [0], [0], [1], [0, 0, 1, 1], [], []>} : vector<8x16xbf16>, vector<16x8xbf16>, vector<8x8xf32> -> vector<8x8xf32>
      %26 = arith.addf %24, %25 : vector<8x8xf32>
      %c0_16 = arith.constant 0 : index
      %27 = arith.index_cast %15 : i32 to index
      %c0_17 = arith.constant 0 : index
      %c0_18 = arith.constant 0 : index
      %28 = vector.load %arg5[%c0_16, %27, %c0_17, %c0_18] : memref<1x4x8x8xf32, #tpu.memory_space<vmem>>, vector<1x1x8x8xf32>
      %29 = vector.shape_cast %28 : vector<1x1x8x8xf32> to vector<8x8xf32>
      %30 = vector.shape_cast %26 : vector<8x8xf32> to vector<1x1x8x8xf32>
      tpu.vector_store %arg5[%c0_16, %27, %c0_17, %c0_18], %30 {strides = array<i32>} : memref<1x4x8x8xf32, #tpu.memory_space<vmem>>, vector<1x1x8x8xf32>,
    }
    %c4_i32_10 = arith.constant 4 : i32
    return
  }
  func.func @transform_0(%arg0: i32, %arg1: i32) -> (i32, i32) {
    %c0_i32 = arith.constant 0 : i32
    %c0_i32_0 = arith.constant 0 : i32
    %c0_i32_1 = arith.constant 0 : i32
    return %c0_i32, %c0_i32_0 : i32, i32
  }
  func.func @transform_1(%arg0: i32, %arg1: i32) -> (i32, i32) {
    %c0_i32 = arith.constant 0 : i32
    %c0_i32_0 = arith.constant 0 : i32
    %c0_i32_1 = arith.constant 0 : i32
    return %c0_i32, %c0_i32_0 : i32, i32
  }
  func.func @transform_2(%arg0: i32, %arg1: i32) -> (i32, i32, i32, i32) {
    %c0_i32 = arith.constant 0 : i32
    %c0_i32_0 = arith.constant 0 : i32
    %c0_i32_1 = arith.constant 0 : i32
    return %arg0, %arg1, %c0_i32, %c0_i32_0 : i32, i32, i32, i32
  }
  func.func @transform_3(%arg0: i32, %arg1: i32) -> (i32, i32, i32, i32) {
    %c0_i32 = arith.constant 0 : i32
    %c0_i32_0 = arith.constant 0 : i32
    %c0_i32_1 = arith.constant 0 : i32
    return %arg0, %arg1, %c0_i32, %c0_i32_0 : i32, i32, i32, i32
  }
}

</mosaic_0001>

<bundles_post_ra>
// kernel: tpu_custom_call.1
= control target key start
LH: loop header
LB: loop body
LE: loop exit
PB: predicated region body
PF: predicated region fallthrough
CT: control target
= control target key end

     0   :  { %8 = vsyncpa [#allocation4], 0  ;;  %s1121_s0 = inlined_call_operand.vmem [shape: bf16[8,16], index: 0, kind: input, shape index: {}]   ;;  %s1122_s1 = inlined_call_operand.vmem [shape: bf16[16,8], index: 1, kind: input, shape index: {}]   ;;  %s1123_s2 = inlined_call_operand.hbm [shape: f32[2,4,16,16], index: 2, kind: input, shape index: {}]   ;;  %s1124_s3 = inlined_call_operand.hbm [shape: f32[2,4,8,8], index: 3, kind: output, shape index: {}]  }
   0x1   :  { %10 = vsyncpa [#allocation4 + $0x1], 0 }
   0x2   :  { %11 = vsyncpa [#allocation5], 0 }
   0x3   :  { %13 = vsyncpa [#allocation5 + $0x1], 0  ;;  %s929_s12 = smov 0   ;;  %s931_s13 = smov 0  }
   0x4   :  { %s933_s14 = smov 0   ;;  %s935_s15 = smov 0  }
   0x5   :  { %s937_s16 = smov 0   ;;  %s939_s17 = smov 0  }
   0x6 LB: > { %s630_s18 = sadd.s32 4294967295, %s895_s17   ;;  %s631_s19 = sadd.s32 4294967294, %s895_s17   ;;  %s895_s17 = sphi %s939_s17, %s19_s17   ;;  %s891_s16 = sphi %s937_s16, %s1135_s16   ;;  %s887_s15 = sphi %s935_s15, %s1134_s15   ;;  %s883_s14 = sphi %s933_s14, %s1133_s14   ;;  %s879_s13 = sphi %s931_s13, %s1132_s13   ;;  %s875_s12 = sphi %s929_s12, %s1131_s12  }
   0x7   : > { %s31_s20 = sadd.s32 1, %s891_s16  ;;  %s82_s21 = sadd.s32 1, %s883_s14 }
   0x8   : > { %p33_p0 = scmp.ge.s32.totalorder %s31_s20, 2  ;;  %p89_p1 = scmp.ne.s32.totalorder %s883_s14, %s879_s13 }
   0x9   : > { %p90_p2 = scmp.eq.s32.totalorder %s895_s17, 0  ;;  %p95_p3 = scmp.ne.s32.totalorder %s879_s13, %s875_s12 }
   0xa   : > { %s1137_s20 = smov (%p33_p0, %s31_s20), 0  ;;  %p96_p5 = scmp.eq.s32.totalorder %s630_s18, 0 }
   0xb   : > { %p970_p4 = por %p90_p2, %p89_p1  ;;  %s77_s23 = ssub.s32 %s891_s16, %s1137_s20 }
   0xc   : > { %p121_p6 = scmp.eq.s32.totalorder %s630_s18, 1  ;;  %p80_p7 = scmp.eq.s32.totalorder %s77_s23, 0 }
   0xd   : > { %p976_p8 = por %p96_p5, %p95_p3  ;;  %p127_p10 = scmp.eq.s32.totalorder %s631_s19, 1 }
   0xe   : > { %p980_p9 = por %p121_p6, %p89_p1  ;;  %p718_p13 = scmp.lt.s32.totalorder %s895_s17, 2 }
   0xf   : > { %s985_s26 = scalar_select %p80_p7, %s883_s14, %s82_s21  }
  0x10   : > { %p987_p11 = por %p127_p10, %p95_p3  ;;  %s153_s28 = sand.u32 1, %s883_s14  }
  0x11   : > { %s634_s29 = sshll.u32 %s153_s28, 6  ;;  %s658_s30 = sshll.u32 %s891_s16, 10 }
  0x12   : > { %s166_s6 = scalar_lea.hbm %s1123_s2, %s658_s30  ;;  %s157_s7 = scalar_lea.vmem [#allocation3], %s634_s29 }
  0x13   : > { %s167_s8 = sshll.u32 %s157_s7, 4  ;;  %p1000_p0 = pnand %p718_p13, %p970_p4  ;;  %s168_s8 = int_to_ptr.vmem [resolvable:$true] %s167_s8 }
  0x14   : > { %p637_p1 = scmp.ge.s32.totalorder %s895_s17, 1  ;;  %s154_s10 = scalar_lea.sflag [#allocation4], %s153_s28 }
  0x15   : > { %p785_p2 = pneg %p1000_p0  ;;  %s796_s11 = scalar_lea.vmem %s168_s8, 1024 }
  0x16   : > { %p797_p3 = scmp.ne.s32.totalorder %s168_s8, %s796_s11  ;;  %s901_s18 = smov [#allocation3]  }
  0x17   : > { %s801_s19 = sshll.u32 %s901_s18, 4  ;;  %s802_s19 = int_to_ptr.vmem [resolvable:$false] %s801_s19 }
  0x18   : > { %p799_p5 = pnand %p797_p3, %p785_p2  ;;  %s803_s21 = scalar_lea.vmem %s802_s19, 2048 }
  0x19   : > { %p804_p7 = scmp.lt.s32.totalorder %s168_s8, %s802_s19  ;;  %p805_p10 = scmp.lt.s32.totalorder %s803_s21, %s796_s11 }
  0x1a   : > { %p800_p6 = pneg %p799_p5 }
  0x1b   : > { %p806_p12 = por %p805_p10, %p804_p7 }
  0x1d   : > { %p807_p4 = pnand %p806_p12, %p800_p6 }
  0x1f   : > { %810 = shalt.err (!%p807_p4)
}
  0x20   : > { %s902_s22 = smov 128   ;;  %s903_s23 = smov 8  }
  0x21   : > { %713 = dma.hbm_to_vmem [thread:$0]  (!%p1000_p0), %s166_s6, 1024, %s168_s8, %s154_s10, %s902_s22, %s902_s22, %s903_s23  }
  0x22   : > { %p175_p13 = scmp.lt.s32.totalorder %s895_s17, 3 }
  0x24   : > { %p176_p2 = pnand %p637_p1, %p175_p13 }
  0x25   : > { %s1013_s28 = sand.u32 (!%p176_p2), 1, %s879_s13  }
  0x26   : > { %179 = sbr.rel (%p176_p2) target bundleno = 496 (0x1f0), region = 32  ;;  %s638_s29 = sshll.u32 (!%p176_p2), %s1013_s28, 6 }
  0x27   : > { %s182_s30 = scalar_lea.sflag (!%p176_p2), [#allocation4], %s1013_s28  ;;  %s185_s4 = scalar_lea.vmem (!%p176_p2), [#allocation3], %s638_s29 }
  0x2b   : > { %866 = dma.done.wait (%p976_p8), %s182_s30, 1024  }
  0x2c   : > { %868 = vsyncadd (%p976_p8), %s182_s30, 4294966272  ;;  %s639_s5 = sshll.u32 %s1013_s28, 5  ;;  %v1025_v0 = vld [vmem:[%s1121_s0] sm:$0xf]  ;;  %v215_v3 = vld [vmem:[%s185_s4 + $0x8] sm:$0xff]  ;;  %vm252_vm0 = vcmask 130048  }
  0x2d   : > { %v782_v1 = vld [vmem:[%s1122_s1] sm:$0xff]   ;;  %v216_v5 = vld [vmem:[%s185_s4 + $0x10] sm:$0xff]  ;;  %v217_v6 = vld [vmem:[%s185_s4 + $0x18] sm:$0xff]  ;;  %vm407_vm1 = vcmask 64512   ;;  %s1048_s24 = scalar_lea.vmem [#allocation6], %s639_s5  ;;  %s1050_s10 = smov 0  }
  0x2e   : > { %v214_v2 = vld [vmem:[%s185_s4] sm:$0xff]  ;;  %684 = vmatprep.subr.bf16.mxu1 %v782_v1  ;;  %674 = vmatprep.subr.bf16.mxu0 %v782_v1  ;;  %v223_v8 = vpack.c.bf16 %v217_v6, %v216_v5  ;;  %v219_v9 = vld [vmem:[%s185_s4 + $0x28] sm:$0xff]  ;;  %v220_v10 = vld [vmem:[%s185_s4 + $0x30] sm:$0xff] }
  0x2f   : > { %v222_v4 = vpack.c.bf16 %v215_v3, %v214_v2  ;;  %v218_v7 = vld [vmem:[%s185_s4 + $0x20] sm:$0xff]  ;;  %v221_v11 = vld [vmem:[%s185_s4 + $0x38] sm:$0xff]  ;;  %685 = vmatpush3.bf16.msra.mxu1 %v782_v1  ;;  %675 = vmatpush3.bf16.msra.mxu0 %v782_v1 }
  0x30   : > { %v224_v14 = vpack.c.bf16 %v219_v9, %v218_v7  ;;  %v225_v15 = vpack.c.bf16 %v221_v11, %v220_v10  ;;  %v228_v16 = vunpack.c.l.bf16 %v223_v8  ;;  %v229_v17 = vunpack.c.h.bf16 %v223_v8 }
  0x31   : > { %686 = vmatprep.mubr.msk.bf16.mxu1 %vm252_vm0, %v222_v4  ;;  %v226_v12 = vunpack.c.l.bf16 %v222_v4  ;;  %v227_v13 = vunpack.c.h.bf16 %v222_v4 }
  0x32   : > { %v230_v20 = vunpack.c.l.bf16 %v224_v14  ;;  %v231_v21 = vunpack.c.h.bf16 %v224_v14  ;;  %687 = vmatmul.mubr.msk.bf16.vlgmr.msra.gmra.mxu1 %vm252_vm0, %v223_v8  ;;  %v236_v22 = vsub.f32 %v216_v5, %v228_v16  ;;  %v237_v23 = vsub.f32 %v217_v6, %v229_v17 }
  0x33   : > { %v234_v18 = vsub.f32 %v214_v2, %v226_v12  ;;  %v235_v19 = vsub.f32 %v215_v3, %v227_v13  ;;  %v232_v24 = vunpack.c.l.bf16 %v225_v15  ;;  %v233_v25 = vunpack.c.h.bf16 %v225_v15  ;;  %690 = vmatprep.mubr.msk.bf16.mxu1 %vm252_vm0, %v224_v14 }
  0x34   : > { %v238_v27 = vsub.f32 %v218_v7, %v230_v20  ;;  %v239_v28 = vsub.f32 %v219_v9, %v231_v21  ;;  %v243_v29 = vpack.c.bf16 %v237_v23, %v236_v22 }
  0x35   : > { %v242_v26 = vpack.c.bf16 %v235_v19, %v234_v18  ;;  %v240_v31 = vsub.f32 %v220_v10, %v232_v24  ;;  %v241_v32 = vsub.f32 %v221_v11, %v233_v25 }
  0x36   : > { %v244_v30 = vpack.c.bf16 %v239_v28, %v238_v27 }
  0x37   : > { %676 = vmatprep.mubr.msk.bf16.mxu0 %vm252_vm0, %v242_v26  ;;  %v245_v33 = vpack.c.bf16 %v241_v32, %v240_v31 }
  0x38   : > { %677 = vmatmul.mubr.msk.bf16.vlgmr.msra.gmra.mxu0 %vm252_vm0, %v243_v29 }
  0x39   : > { %680 = vmatprep.mubr.msk.bf16.mxu0 %vm252_vm0, %v244_v30 }
  0x3a   : > { %691 = vmatmul.mubr.msk.bf16.gmra.mxu1 %vm252_vm0, %v225_v15 }
  0x40   : > { %681 = vmatmul.mubr.msk.bf16.gmra.mxu0 %vm252_vm0, %v245_v33 }
  0xf2   : > { %v688_v34 = vpop.f32.mrf.mxu1 }
  0xf4   : > { %v376_v35 = vpop.f32.mrf.mxu1 }
  0xf6   : > { %v689_v37 = vpop.f32.mrf.mxu1 }
  0xf8   : > { %v678_v36 = vpop.f32.mrf.mxu0  ;;  %v379_v40 = vpop.f32.mrf.mxu1 }
  0xf9   : > { %v385_v38 = vadd.f32 %v688_v34, %v678_v36 }
  0xfa   : > { %v299_v39 = vpop.f32.mrf.mxu0  ;;  %v692_v43 = vpop.f32.mrf.mxu1 }
  0xfb   : > { %410 = vst.msk [vmem:[#allocation2 + $0x10] sm:$0xff] %vm407_vm1, %v385_v38  ;;  %v377_v41 = vadd.f32 %v376_v35, %v299_v39 }
  0xfc   : > { %v679_v42 = vpop.f32.mrf.mxu0  ;;  %v392_v46 = vpop.f32.mrf.mxu1 }
  0xfd   : > { %408 = vst.msk [vmem:[#allocation2] sm:$0xff] %vm407_vm1, %v377_v41  ;;  %v388_v44 = vadd.f32 %v689_v37, %v679_v42 }
  0xfe   : > { %v302_v45 = vpop.f32.mrf.mxu0  ;;  %v693_v50 = vpop.f32.mrf.mxu1 }
  0xff   : > { %411 = vst.msk [vmem:[#allocation2 + $0x18] sm:$0xff] %vm407_vm1, %v388_v44  ;;  %v380_v47 = vadd.f32 %v379_v40, %v302_v45 }
 0x100   : > { %v682_v48 = vpop.f32.mrf.mxu0  ;;  %v395_v55 = vpop.f32.mrf.mxu1 }
 0x101   : > { %409 = vst.msk [vmem:[#allocation2 + $0x8] sm:$0xff] %vm407_vm1, %v380_v47  ;;  %v401_v49 = vadd.f32 %v692_v43, %v682_v48 }
 0x102   : > { %v315_v51 = vpop.f32.mrf.mxu0 }
 0x103   : > { %414 = vst.msk [vmem:[#allocation2 + $0x30] sm:$0xff] %vm407_vm1, %v401_v49  ;;  %v393_v52 = vadd.f32 %v392_v46, %v315_v51 }
 0x104   : > { %v683_v53 = vpop.f32.mrf.mxu0 }
 0x105   : > { %412 = vst.msk [vmem:[#allocation2 + $0x20] sm:$0xff] %vm407_vm1, %v393_v52  ;;  %v404_v54 = vadd.f32 %v693_v50, %v683_v53 }
 0x106   : > { %v318_v56 = vpop.f32.mrf.mxu0 }
 0x107   : > { %415 = vst.msk [vmem:[#allocation2 + $0x38] sm:$0xff] %vm407_vm1, %v404_v54  ;;  %v396_v57 = vadd.f32 %v395_v55, %v318_v56 }
 0x109   : > { %413 = vst.msk [vmem:[#allocation2 + $0x28] sm:$0xff] %vm407_vm1, %v396_v57 }
 0x10a LB: >> { %v904_v58 = vmov 0.0   ;;  %vm905_vm2 = vmmov 0   ;;  %s649_s11 = sshll.u32 %s899_s10, 4  ;;  %s652_s19 = sshll.u32 %s899_s10, 3  ;;  %s899_s10 = sphi %s1050_s10, %s421_s10  }
 0x10b   : >> { %700 = vmatprep.subr.bf16.mxu1 %v904_v58  ;;  %702 = vmatprep.mubr.msk.bf16.mxu1 %vm905_vm2, %v904_v58  ;;  %s423_s18 = scalar_lea.vmem [#allocation2], %s649_s11  ;;  %s516_s21 = scalar_lea.vmem %s1048_s24, %s652_s19 [#allocation6] }
 0x10c   : >> { %694 = vmatprep.subr.bf16.mxu0 %v904_v58  ;;  %696 = vmatprep.mubr.msk.bf16.mxu0 %vm905_vm2, %v904_v58  ;;  %s421_s10 = sadd.s32 1, %s899_s10  }
 0x10d   : >> { %p418_p8 = scmp.ge.s32.totalorder %s421_s10, 4  }
 0x10e   : > { %s659_s22 = sshll.u32 (%p418_p8), %s887_s15, 9  ;;  %s534_s4 = sshll.u32 (%p418_p8), %s1048_s24, 4  ;;  %s1073_s4 = int_to_ptr.vmem [resolvable:$true] %s534_s4 }
 0x10f   : > { %s1070_s30 = scalar_lea.hbm (%p418_p8), %s1124_s3, %s659_s22  ;;  %s519_s5 = scalar_lea.sflag (%p418_p8), [#allocation5], %s1013_s28 }
 0x110   : >> { %v424_v59 = vld [vmem:[%s423_s18] sm:$0xff]  ;;  %v425_v60 = vld [vmem:[%s423_s18 + $0x8] sm:$0xff]  ;;  %s811_s6 = scalar_lea.vmem (%p418_p8), %s1073_s4, 512  ;;  %s906_s7 = smov (%p418_p8), [#allocation6]  }
 0x111   : >> { %v426_v61 = vpack.c.bf16 %v425_v60, %v424_v59  ;;  %p812_p12 = scmp.ne.s32.totalorder (%p418_p8), %s1073_s4, %s811_s6  ;;  %s815_s8 = sshll.u32 (%p418_p8), %s906_s7, 4  ;;  %s816_s8 = int_to_ptr.vmem [resolvable:$false] %s815_s8 }
 0x112   : > { %s817_s15 = scalar_lea.vmem (%p418_p8), %s816_s8, 1024  ;;  %p818_p3 = scmp.lt.s32.totalorder (%p418_p8), %s1073_s4, %s816_s8 }
 0x113   : >> { %701 = vmatpush3.bf16.msra.mxu1 %v426_v61  ;;  %v427_v62 = vunpack.c.l.bf16 %v426_v61  ;;  %v428_v63 = vunpack.c.h.bf16 %v426_v61  ;;  %p813_p0 = pnand (%p418_p8), %p812_p12, %p980_p9  ;;  %p819_p5 = scmp.lt.s32.totalorder (%p418_p8), %s817_s15, %s811_s6 }
 0x115   : >> { %v429_v1 = vsub.f32 %v424_v59, %v427_v62  ;;  %v430_v2 = vsub.f32 %v425_v60, %v428_v63  ;;  %p814_p1 = pneg (%p418_p8), %p813_p0  ;;  %p820_p6 = por (%p418_p8), %p819_p5, %p818_p3 }
 0x116   : >> { %703 = vmatmul.mubr.msk.bf16.vlgmr.msra.gmra.mxu1 %vm252_vm0, %v1025_v0 }
 0x117   : >> { %v431_v3 = vpack.c.bf16 %v430_v2, %v429_v1  ;;  %p821_p7 = pnand (%p418_p8), %p820_p6, %p814_p1 }
 0x119   : >> { %695 = vmatpush3.bf16.msra.mxu0 %v431_v3 }
 0x11c   : >> { %697 = vmatmul.mubr.msk.bf16.vlgmr.msra.gmra.mxu0 %vm252_vm0, %v1025_v0 }
 0x1d6   : >> { %v509_v4 = vpop.f32.mrf.mxu1 }
 0x1d8   : >> { %v704_v5 = vpop.f32.mrf.mxu1 }
 0x1da   : >> { %v512_v6 = vpop.f32.mrf.mxu1 }
 0x1dc   : >> { %v469_v7 = vpop.f32.mrf.mxu0  ;;  %v705_v8 = vpop.f32.mrf.mxu1 }
 0x1dd   : >> { %v510_v9 = vadd.f32 %v509_v4, %v469_v7 }
 0x1de   : >> { %v698_v10 = vpop.f32.mrf.mxu0  ;;  %420 = sbr.rel (!%p418_p8) target bundleno = 266 (0x10a), region = 86 }
 0x1df   : >> { %517 = vst.msk [vmem:[%s516_s21] sm:$0xff] %vm407_vm1, %v510_v9 }
 0x1e0   : >> { %v472_v11 = vpop.f32.mrf.mxu0 }
 0x1e2   : >> { %v699_v12 = vpop.f32.mrf.mxu0 }
 0x1e3   : > { %824 = shalt.err (!%p821_p7)
}
 0x1e4   : > { %s825_s9 = scalar_lea.hbm %s1070_s30, 512  ;;  %s829_s11 = scalar_lea.hbm %s1124_s3, 1024 }
 0x1e5   : > { %p826_p10 = scmp.ne.s32.totalorder %s1070_s30, %s825_s9  ;;  %p830_p2 = scmp.lt.s32.totalorder %s1070_s30, %s1124_s3 }
 0x1e6   : > { %p831_p8 = scmp.lt.s32.totalorder %s829_s11, %s825_s9 }
 0x1e7   : > { %p827_p4 = pnand %p826_p10, %p980_p9 }
 0x1e8   : > { %p832_p12 = por %p831_p8, %p830_p2 }
 0x1e9   : > { %p828_p13 = pneg %p827_p4 }
 0x1eb   : > { %p833_p0 = pnand %p832_p12, %p828_p13 }
 0x1ed   : > { %836 = shalt.err (!%p833_p0)
}
 0x1ee   : > { %s907_s21 = smov 128   ;;  %s908_s22 = smov 8  }
 0x1ef   : > { %708 = dma.vmem_to_hbm [thread:$0]  (%p980_p9), %s1073_s4, 512, %s1070_s30, %s519_s5, %s907_s21, %s907_s21, %s908_s22  }
 0x1f0 PF: > { %s549_s23 = sand.u32 1, %s875_s12   ;;  %p1130_p1 = scmp.ge.s32.totalorder %s895_s17, 2 }
 0x1f1   : > { %s550_s29 = scalar_lea.sflag [#allocation5], %s549_s23 }
 0x1f2   : > { %p715_p3 = pnand %p1130_p1, %p987_p11 }
 0x1f4   : > { %p716_p5 = pneg %p715_p3 }
 0x1f6   : > { %870 = dma.done.wait (%p716_p5), %s550_s29, 512  }
 0x1f7   : > { %872 = vsyncadd (%p716_p5), %s550_s29, 4294966784  ;;  %s19_s17 = sadd.s32 1, %s895_s17   ;;  %s1131_s12 = smov %s879_s13 }
 0x1f8   : > { %p16_p6 = scmp.ge.s32.totalorder %s19_s17, 4   ;;  %s1132_s13 = smov %s883_s14 }
 0x1f9   : > { %s1133_s14 = smov %s985_s26  ;;  %s1134_s15 = smov %s891_s16 }
 0x1fa   : > { %s1135_s16 = smov %s1137_s20  ;;  %18 = sbr.rel (!%p16_p6) target bundleno = 6 (0x6), region = 97 }
 0x1ff   :  { %555 = vsyncpa [#allocation4], 1 }
 0x200   :  { %557 = vsyncpa [#allocation4 + $0x1], 1 }
 0x201   :  { %558 = vsyncpa [#allocation5], 1 }
 0x202   :  { %560 = vsyncpa [#allocation5 + $0x1], 1 }

</bundles_post_ra>
